<compile_context>
chip_gen: v7x
topology: tpu7x:2x2x1
jax: 0.10.0
libtpu: 0.0.40
codegen_flags: <defaults>
</compile_context>

<pallas_src>
import numpy as np
import jax
import jax.numpy as jnp
from jax.experimental import pallas as pl
from jax.experimental.pallas import tpu as pltpu

# ----------------------------------------------------------------------------
# "Environment" configuration (synthetic, stands in for env.observation_space)
# ----------------------------------------------------------------------------
OBS_SHAPE = (4, 16, 16)              # env.observation_space.shape
OBS_FLAT = int(np.prod(OBS_SHAPE))   # 1024
HIDDEN = 128
N_ACT = int(np.sum(OBS_SHAPE))       # 36  (sum of decoder output widths)
OUT_FUSED = N_ACT + 1                # 37  (decoders + value head)
OUT_PAD = 128                        # lane-dense padded output width
BATCH = 2


def _round_up(x, m):
    return ((x + m - 1) // m) * m


def _choose_batch_tile(b):
    # Large tiles amortize per-grid-step overhead and fill the MXU M dim; cap
    # at 512 rows (~2 MiB f32 x-tile; ~7 MiB VMEM with double buffering, safe
    # on v5e/v6e/v7x default scoped limits).
    tb = min(512, _round_up(max(b, 1), 8))
    # Prefer >= 2 parallel grid steps so v7x's two TensorCores both get work.
    if b > 8 and pl.cdiv(b, tb) < 2:
        tb = max(8, _round_up(pl.cdiv(b, 2), 8))
    return tb


# ----------------------------------------------------------------------------
# Pallas kernel: single folded matmul (encoder @ [decoders | value]) + bias
# ----------------------------------------------------------------------------
def policy_kernel(x_ref, wf_ref, bias_ref, out_ref):
    # x_ref:    (TB, D)        flattened observation tile (f32 or bf16)
    # wf_ref:   (D, OUT_PAD)   bf16 folded weight, zero-padded to 128 lanes
    # bias_ref: (1, OUT_PAD)   f32 folded bias, zero-padded
    # out_ref:  (TB, OUT_PAD)  f32 lane-dense fused outputs (heads + value)
    x = x_ref[...].astype(jnp.bfloat16)   # no-op if observations already bf16
    out = jnp.dot(x, wf_ref[...], preferred_element_type=jnp.float32)
    out_ref[...] = out + bias_ref[...]


def policy_forward(x_nchw, params):
    """Fused Policy forward pass.

    Args:
      x_nchw: [B, C, H, W] observations (float32 or bfloat16).
      params: dict with "wf" (D, OUT_PAD) bf16 and "bias" (1, OUT_PAD) f32.

    Returns:
      (actions, value): actions is a list of [B, n_i] arrays (one per obs dim),
      value is [B, 1].
    """
    B = x_nchw.shape[0]
    # TODO(synk): produce observations in bf16 upstream of this call to halve
    # the dominant x-tile HBM DMA (a standalone .astype here would just add its
    # own HBM round trip, so we keep the input dtype as given).
    x = x_nchw.reshape(B, -1)                       # (B, D) -- glue reshape
    D = x.shape[1]

    TB = _choose_batch_tile(B)
    grid = (pl.cdiv(B, TB),)                        # partial last block is masked

    bytes_accessed = (x.size * x.dtype.itemsize
                      + params["wf"].size * params["wf"].dtype.itemsize
                      + params["bias"].size * params["bias"].dtype.itemsize
                      + B * OUT_PAD * 4)
    cost = pl.CostEstimate(flops=2 * B * D * OUT_PAD,
                           transcendentals=0,
                           bytes_accessed=bytes_accessed)

    out = pl.pallas_call(
        policy_kernel,
        out_shape=jax.ShapeDtypeStruct((B, OUT_PAD), jnp.float32),
        grid=grid,
        in_specs=[
            pl.BlockSpec((TB, D), lambda i: (i, 0)),            # x (batch-tiled)
            pl.BlockSpec((D, OUT_PAD), lambda i: (0, 0)),       # folded weight
            pl.BlockSpec((1, OUT_PAD), lambda i: (0, 0)),       # folded bias
        ],
        out_specs=pl.BlockSpec((TB, OUT_PAD), lambda i: (i, 0)),
        compiler_params=pltpu.CompilerParams(
            dimension_semantics=("parallel",)),
        cost_estimate=cost,
    )(x, params["wf"], params["bias"])

    # Split the fused, padded output back into per-head tensors + value.
    ends = np.cumsum(OBS_SHAPE).tolist()            # [4, 20, 36]
    starts = [0] + ends[:-1]
    actions = [out[:, s:e] for s, e in zip(starts, ends)]
    value = out[:, N_ACT:N_ACT + 1]
    return actions, value


# ----------------------------------------------------------------------------
# Deterministic parameter initialization (mimics nn.Linear shapes) + folding
# ----------------------------------------------------------------------------
def init_params(key):
    keys = jax.random.split(key, 5)

    def linear(kw, kb, fan_in, fan_out):
        # PyTorch Linear stores weight as (out, in); we keep the transpose.
        bound = 1.0 / np.sqrt(fan_in)
        w = jax.random.uniform(kw, (fan_in, fan_out), jnp.float32, -bound, bound)
        b = jax.random.uniform(kb, (1, fan_out), jnp.float32, -bound, bound)
        return w, b

    we, be = linear(keys[0], keys[1], OBS_FLAT, HIDDEN)

    dec_ws, dec_bs = [], []
    dkeys = jax.random.split(keys[2], 2 * len(OBS_SHAPE))
    for i, n in enumerate(OBS_SHAPE):
        w, b = linear(dkeys[2 * i], dkeys[2 * i + 1], HIDDEN, n)
        dec_ws.append(w)
        dec_bs.append(b)
    wv, bv = linear(keys[3], keys[4], HIDDEN, 1)

    # Fuse decoder heads + value head along the output axis...
    wd = jnp.concatenate(dec_ws + [wv], axis=1)           # (H, OUT_FUSED)
    bd = jnp.concatenate(dec_bs + [bv], axis=1)           # (1, OUT_FUSED)
    # ...and fold the (purely linear, no activation) encoder into them:
    #   (x @ We + be) @ Wd + bd  ==  x @ (We @ Wd) + (be @ Wd + bd)
    wf = we @ wd                                           # (D, OUT_FUSED) f32
    bf = be @ wd + bd                                      # (1, OUT_FUSED) f32
    wf = jnp.pad(wf, ((0, 0), (0, OUT_PAD - OUT_FUSED)))   # zero-pad to 128 lanes
    bf = jnp.pad(bf, ((0, 0), (0, OUT_PAD - OUT_FUSED)))

    kernel_params = {
        "wf": wf.astype(jnp.bfloat16),                     # (D, OUT_PAD) bf16
        "bias": bf.astype(jnp.float32),                    # (1, OUT_PAD) f32
    }
    ref_params = {"we": we, "be": be, "dec_ws": dec_ws, "dec_bs": dec_bs,
                  "wv": wv, "bv": bv}
    return kernel_params, ref_params


def reference_forward(x_nchw, ref):
    """Unfused, full-f32 reference mirroring the PyTorch module exactly."""
    B = x_nchw.shape[0]
    x = x_nchw.reshape(B, -1).astype(jnp.float32)
    hidden = x @ ref["we"] + ref["be"]
    actions = [hidden @ w + b for w, b in zip(ref["dec_ws"], ref["dec_bs"])]
    value = hidden @ ref["wv"] + ref["bv"]
    return actions, value


if __name__ == "__main__":
    key = jax.random.PRNGKey(0)
    kx, kp = jax.random.split(key)

    x = jax.random.normal(kx, (BATCH,) + OBS_SHAPE, dtype=jnp.float32)
    params, ref_params = init_params(kp)

    forward = jax.jit(policy_forward)                  # kernel + slicing fused
    actions, value = forward(x, params)
    actions = [jax.block_until_ready(a) for a in actions]
    value = jax.block_until_ready(value)

    # Check against the unfused f32 reference (bf16 weights -> loose tolerance).
    ref_actions, ref_value = reference_forward(x, ref_params)
    for a, ra, n in zip(actions, ref_actions, OBS_SHAPE):
        assert a.shape == (BATCH, n), a.shape
        np.testing.assert_allclose(np.asarray(a), np.asarray(ra),
                                   rtol=2e-2, atol=2e-2)
    assert value.shape == (BATCH, 1), value.shape
    np.testing.assert_allclose(np.asarray(value), np.asarray(ref_value),
                               rtol=2e-2, atol=2e-2)

    print("KERNEL_OK")
</pallas_src>

<mosaic_0001>
module attributes {stable_mosaic.version = 11 : i64} {
  func.func @policy_kernel(%arg0: i32, %arg1: memref<8x1024xf32, #tpu.memory_space<vmem>>, %arg2: memref<1024x128xbf16, #tpu.memory_space<vmem>>, %arg3: memref<1x128xf32, #tpu.memory_space<vmem>>, %arg4: memref<8x128xf32, #tpu.memory_space<vmem>>) attributes {dimension_semantics = [#tpu.dimension_semantics<parallel>], iteration_bounds = array<i64: 1>, scalar_prefetch = 0 : i64, scratch_operands = 0 : i64, tpu.core_type = #tpu.core_type<tc>, window_params = [{transform_indices = @transform_0, window_bounds = array<i64: 8, 1024>}, {pipeline_mode = #tpu.pipeline_mode<synchronous>, transform_indices = @transform_1, window_bounds = array<i64: 1024, 128>}, {pipeline_mode = #tpu.pipeline_mode<synchronous>, transform_indices = @transform_2, window_bounds = array<i64: 1, 128>}, {transform_indices = @transform_3, window_bounds = array<i64: 8, 128>}]} {
    %c0 = arith.constant 0 : index
    %c0_0 = arith.constant 0 : index
    %0 = vector.load %arg1[%c0, %c0_0] : memref<8x1024xf32, #tpu.memory_space<vmem>>, vector<8x1024xf32>
    %1 = arith.truncf %0 : vector<8x1024xf32> to vector<8x1024xbf16>
    %c0_1 = arith.constant 0 : index
    %c0_2 = arith.constant 0 : index
    %2 = vector.load %arg2[%c0_1, %c0_2] : memref<1024x128xbf16, #tpu.memory_space<vmem>>, vector<1024x128xbf16>
    %cst = arith.constant dense<0.000000e+00> : vector<8x128xf32>
    %3 = tpu.matmul %1, %2, %cst {dimension_numbers = #tpu.dot_dimension_numbers<[1], [0], [0], [1], [0, 0, 1, 1], [], []>} : vector<8x1024xbf16>, vector<1024x128xbf16>, vector<8x128xf32> -> vector<8x128xf32>
    %c0_3 = arith.constant 0 : index
    %c0_4 = arith.constant 0 : index
    %4 = vector.load %arg3[%c0_3, %c0_4] : memref<1x128xf32, #tpu.memory_space<vmem>>, vector<1x128xf32>
    %5 = vector.broadcast %4 : vector<1x128xf32> to vector<8x128xf32>
    %6 = arith.addf %3, %5 : vector<8x128xf32>
    %c0_5 = arith.constant 0 : index
    %c0_6 = arith.constant 0 : index
    %7 = vector.load %arg4[%c0_5, %c0_6] : memref<8x128xf32, #tpu.memory_space<vmem>>, vector<8x128xf32>
    tpu.vector_store %arg4[%c0_5, %c0_6], %6 {strides = array<i32>} : memref<8x128xf32, #tpu.memory_space<vmem>>, vector<8x128xf32>,
    return
  }
  func.func @transform_0(%arg0: i32) -> (i32, i32) {
    %c0_i32 = arith.constant 0 : i32
    %c0_i32_0 = arith.constant 0 : i32
    return %arg0, %c0_i32 : i32, i32
  }
  func.func @transform_1(%arg0: i32) -> (i32, i32) {
    %c0_i32 = arith.constant 0 : i32
    %c0_i32_0 = arith.constant 0 : i32
    %c0_i32_1 = arith.constant 0 : i32
    return %c0_i32, %c0_i32_0 : i32, i32
  }
  func.func @transform_2(%arg0: i32) -> (i32, i32) {
    %c0_i32 = arith.constant 0 : i32
    %c0_i32_0 = arith.constant 0 : i32
    %c0_i32_1 = arith.constant 0 : i32
    return %c0_i32, %c0_i32_0 : i32, i32
  }
  func.func @transform_3(%arg0: i32) -> (i32, i32) {
    %c0_i32 = arith.constant 0 : i32
    %c0_i32_0 = arith.constant 0 : i32
    return %arg0, %c0_i32 : i32, i32
  }
}

</mosaic_0001>

<bundles_post_ra>
// kernel: policy_forward.1
= control target key start
LH: loop header
LB: loop body
LE: loop exit
PB: predicated region body
PF: predicated region fallthrough
CT: control target
= control target key end

     0   :  { %8 = vsyncpa [#allocation3], 0  ;;  %s1110_s12 = smov [#allocation2]   ;;  %s1186_s0 = inlined_call_operand.vmem [shape: f32[2,1024], index: 0, kind: input, shape index: {}]   ;;  %s1187_s1 = inlined_call_operand.hbm [shape: bf16[1024,128], index: 1, kind: input, shape index: {}]   ;;  %s1188_s2 = inlined_call_operand.vmem [shape: f32[1,128], index: 2, kind: input, shape index: {}]   ;;  %s1189_s3 = inlined_call_operand.vmem [shape: f32[2,128], index: 3, kind: output, shape index: {}]  }
   0x1   :  { %s16_s13 = sshll.u32 %s1110_s12, 4  ;;  %s1086_s16 = scalar_lea.hbm %s1187_s1, 8192  ;;  %s17_s13 = int_to_ptr.vmem [resolvable:$true] %s16_s13 }
   0x2   :  { %p1087_p0 = scmp.ne.s32.totalorder %s1187_s1, %s1086_s16  ;;  %p1090_p1 = scmp.lt.u32.totalorder %s1086_s16, %s1187_s1 }
   0x4   :  { %p1092_p2 = pnand %p1090_p1, %p1087_p0 }
   0x6   :  { %1095 = shalt.err (!%p1092_p2)
}
   0x7   :  { %s1096_s21 = scalar_lea.vmem %s17_s13, 8192  ;;  %p1101_p4 = scmp.lt.s32.totalorder %s17_s13, %s17_s13 }
   0x8   :  { %p1097_p3 = scmp.ne.s32.totalorder %s17_s13, %s1096_s21  ;;  %p1102_p5 = scmp.lt.s32.totalorder %s1096_s21, %s1096_s21 }
   0xa   :  { %p1103_p6 = por %p1102_p5, %p1101_p4 }
   0xc   :  { %p1104_p7 = pnand %p1103_p6, %p1097_p3 }
   0xe   :  { %1107 = shalt.err (!%p1104_p7)
}
   0xf   :  { %s1111_s22 = smov 64   ;;  %s1112_s23 = smov 4  }
  0x10   :  { %22 = dma.hbm_to_vmem [thread:$0]  %s1187_s1, 8192, %s17_s13, [#allocation3], %s1111_s22, %s1111_s22, %s1112_s23  }
  0x11   :  { %1108 = dma.done.wait [#allocation3], 8192  }
  0x12   :  { %1109 = vsyncadd [#allocation3], 4294959104  ;;  %v1010_v0 = vld [vmem:[#allocation2 + $0x40] sm:$0xff]   ;;  %v1014_v4 = vld [vmem:[#allocation2 + $0x48] sm:$0xff]   ;;  %v1113_v24 = vmov 1983009808   ;;  %v52_v26 = vlaneseq }
  0x13   :  { %v1011_v1 = vld [vmem:[#allocation2 + $0xc0] sm:$0xff]   ;;  %918 = vmatprep.subr.bf16.mxu0 %v1010_v0  ;;  %v1015_v5 = vld [vmem:[#allocation2 + $0xc8] sm:$0xff]   ;;  %v1018_v8 = vld [vmem:[#allocation2 + $0x50] sm:$0xff]   ;;  %v50_v25 = vunpack.c.l.s4 %v1113_v24 }
  0x14   :  { %v1012_v2 = vld [vmem:[#allocation2] sm:$0xff]   ;;  %940 = vmatprep.subr.bf16.mxu1 %v1011_v1  ;;  %v1016_v6 = vld [vmem:[#allocation2 + $0x8] sm:$0xff]   ;;  %v1019_v9 = vld [vmem:[#allocation2 + $0xd0] sm:$0xff]   ;;  %v53_v32 = vshrl.u32 %v52_v26, 7 }
  0x15   :  { %v1013_v3 = vld [vmem:[#allocation2 + $0x80] sm:$0xff]   ;;  %919 = vmatpush3.bf16.msra.mxu0 %v1012_v2  ;;  %v1017_v7 = vld [vmem:[#allocation2 + $0x88] sm:$0xff]   ;;  %v1020_v10 = vld [vmem:[#allocation2 + $0x10] sm:$0xff]   ;;  %v51_v31 = vunpack.c.0.s8 %v50_v25 }
  0x16   :  { %941 = vmatpush3.bf16.msra.mxu1 %v1013_v3  ;;  %920 = vmatprep.subr.bf16.mxu0 %v1014_v4  ;;  %v1021_v11 = vld [vmem:[#allocation2 + $0x90] sm:$0xff]   ;;  %v1022_v12 = vld [vmem:[#allocation2 + $0x58] sm:$0xff]   ;;  %v1026_v16 = vld [vmem:[#allocation2 + $0x60] sm:$0xff]  }
  0x17   :  { %942 = vmatprep.subr.bf16.mxu1 %v1015_v5  ;;  %v1023_v13 = vld [vmem:[#allocation2 + $0xd8] sm:$0xff]   ;;  %v1027_v17 = vld [vmem:[#allocation2 + $0xe0] sm:$0xff]   ;;  %v1030_v20 = vld [vmem:[#allocation2 + $0x68] sm:$0xff]   ;;  %v1146_v37 = vsub.s32 %v51_v31, %v53_v32 }
  0x18   :  { %v1024_v14 = vld [vmem:[#allocation2 + $0x18] sm:$0xff]   ;;  %v1028_v18 = vld [vmem:[#allocation2 + $0x20] sm:$0xff]   ;;  %v1031_v21 = vld [vmem:[#allocation2 + $0xe8] sm:$0xff]  }
  0x19   :  { %921 = vmatpush3.bf16.msra.mxu0 %v1016_v6  ;;  %v1025_v15 = vld [vmem:[#allocation2 + $0x98] sm:$0xff]   ;;  %v1029_v19 = vld [vmem:[#allocation2 + $0xa0] sm:$0xff]   ;;  %v1032_v22 = vld [vmem:[#allocation2 + $0x28] sm:$0xff]  }
  0x1a   :  { %943 = vmatpush3.bf16.msra.mxu1 %v1017_v7  ;;  %922 = vmatprep.subr.bf16.mxu0 %v1018_v8  ;;  %v1033_v23 = vld [vmem:[#allocation2 + $0xa8] sm:$0xff]   ;;  %v1034_v27 = vld [vmem:[#allocation2 + $0x70] sm:$0xff]   ;;  %v1038_v33 = vld [vmem:[#allocation2 + $0x78] sm:$0xff]  }
  0x1b   :  { %944 = vmatprep.subr.bf16.mxu1 %v1019_v9  ;;  %v1035_v28 = vld [vmem:[#allocation2 + $0xf0] sm:$0xff]   ;;  %v1039_v34 = vld [vmem:[#allocation2 + $0xf8] sm:$0xff]   ;;  %v1048_v44 = vld [vmem:[#allocation2 + $0x140] sm:$0xff]  }
  0x1c   :  { %v1036_v29 = vld [vmem:[#allocation2 + $0x30] sm:$0xff]   ;;  %v1040_v35 = vld [vmem:[#allocation2 + $0x38] sm:$0xff]   ;;  %v1049_v47 = vld [vmem:[#allocation2 + $0x1c0] sm:$0xff]  }
  0x1d   :  { %923 = vmatpush3.bf16.msra.mxu0 %v1020_v10  ;;  %v1037_v30 = vld [vmem:[#allocation2 + $0xb0] sm:$0xff]   ;;  %v1041_v36 = vld [vmem:[#allocation2 + $0xb8] sm:$0xff]   ;;  %v1050_v50 = vld [vmem:[#allocation2 + $0x100] sm:$0xff]  }
  0x1e   :  { %945 = vmatpush3.bf16.msra.mxu1 %v1021_v11  ;;  %924 = vmatprep.subr.bf16.mxu0 %v1022_v12  ;;  %v1042_v38 = vld [vmem:[%s1186_s0] ss:$16 sps:$4 sm:$0xff]   ;;  %v1046_v40 = vld [vmem:[%s1186_s0 + $0x4] ss:$16 sps:$4 sm:$0xff]   ;;  %v1052_v56 = vld [vmem:[#allocation2 + $0x148] sm:$0xff]  }
  0x1f   :  { %946 = vmatprep.subr.bf16.mxu1 %v1023_v13  ;;  %v1044_v39 = vld [vmem:[%s1186_s0 + $0x20] ss:$16 sps:$4 sm:$0xff]   ;;  %v1047_v41 = vld [vmem:[%s1186_s0 + $0x24] ss:$16 sps:$4 sm:$0xff]   ;;  %v55_v42 = vrot.slane %v1042_v38, %v1146_v37  ;;  %v62_v45 = vrot.slane %v1046_v40, %v1146_v37  ;;  %v1053_v59 = vld [vmem:[#allocation2 + $0x1c8] sm:$0xff]  }
  0x20   :  { %v69_v43 = vrot.slane %v1044_v39, %v1146_v37  ;;  %v76_v46 = vrot.slane %v1047_v41, %v1146_v37  ;;  %v1051_v53 = vld [vmem:[#allocation2 + $0x180] sm:$0xff]   ;;  %v1054_v60 = vld [vmem:[#allocation2 + $0x108] sm:$0xff]   ;;  %v1056_v62 = vld [vmem:[#allocation2 + $0x150] sm:$0xff]  }
  0x21   :  { %925 = vmatpush3.bf16.msra.mxu0 %v1024_v14  ;;  %v1055_v61 = vld [vmem:[#allocation2 + $0x188] sm:$0xff]   ;;  %v1057_v63 = vld [vmem:[#allocation2 + $0x1d0] sm:$0xff]   ;;  %v1060_v2 = vld [vmem:[#allocation2 + $0x158] sm:$0xff]  }
  0x22   :  { %947 = vmatpush3.bf16.msra.mxu1 %v1025_v15  ;;  %926 = vmatprep.subr.bf16.mxu0 %v1026_v16  ;;  %v78_v48 = vcombine.high %v55_v42, %v69_v43  ;;  %v77_v49 = vcombine.low %v55_v42, %v69_v43  ;;  %v80_v51 = vcombine.high %v62_v45, %v76_v46  ;;  %v1058_v0 = vld [vmem:[#allocation2 + $0x110] sm:$0xff]   ;;  %v1061_v3 = vld [vmem:[#allocation2 + $0x1d8] sm:$0xff]   ;;  %v1064_v6 = vld [vmem:[#allocation2 + $0x160] sm:$0xff]  }
  0x23   :  { %948 = vmatprep.subr.bf16.mxu1 %v1027_v17  ;;  %v79_v52 = vcombine.low %v62_v45, %v76_v46  ;;  %v1059_v1 = vld [vmem:[#allocation2 + $0x190] sm:$0xff]   ;;  %v1062_v4 = vld [vmem:[#allocation2 + $0x118] sm:$0xff]   ;;  %v1065_v7 = vld [vmem:[#allocation2 + $0x1e0] sm:$0xff]  }
  0x24   :  { %v126_v54 = vpack.c.bf16 %v78_v48, %v78_v48  ;;  %v125_v55 = vpack.c.bf16 %v77_v49, %v77_v49  ;;  %v128_v57 = vpack.c.bf16 %v80_v51, %v80_v51  ;;  %v1063_v5 = vld [vmem:[#allocation2 + $0x198] sm:$0xff]   ;;  %v1066_v8 = vld [vmem:[#allocation2 + $0x120] sm:$0xff]   ;;  %v1068_v10 = vld [vmem:[#allocation2 + $0x168] sm:$0xff]  }
  0x25   :  { %927 = vmatpush3.bf16.msra.mxu0 %v1028_v18  ;;  %v127_v58 = vpack.c.bf16 %v79_v52, %v79_v52  ;;  %v1067_v9 = vld [vmem:[#allocation2 + $0x1a0] sm:$0xff]   ;;  %v1069_v11 = vld [vmem:[#allocation2 + $0x1e8] sm:$0xff]   ;;  %v1072_v14 = vld [vmem:[#allocation2 + $0x170] sm:$0xff]  }
  0x26   :  { %949 = vmatpush3.bf16.msra.mxu1 %v1029_v19  ;;  %928 = vmatprep.subr.bf16.mxu0 %v1030_v20  ;;  %v1070_v12 = vld [vmem:[#allocation2 + $0x128] sm:$0xff]   ;;  %v1073_v15 = vld [vmem:[#allocation2 + $0x1f0] sm:$0xff]   ;;  %v1076_v18 = vld [vmem:[#allocation2 + $0x178] sm:$0xff]  }
  0x27   :  { %950 = vmatprep.subr.bf16.mxu1 %v1031_v21  ;;  %684 = vmatprep.mubr.bf16.mxu0 %v126_v54  ;;  %v1071_v13 = vld [vmem:[#allocation2 + $0x1a8] sm:$0xff]   ;;  %v1074_v16 = vld [vmem:[#allocation2 + $0x130] sm:$0xff]   ;;  %v1077_v19 = vld [vmem:[#allocation2 + $0x1f8] sm:$0xff]  }
  0x28   :  { %724 = vmatprep.mubr.bf16.mxu1 %v128_v57  ;;  %v1075_v17 = vld [vmem:[#allocation2 + $0x1b0] sm:$0xff]   ;;  %v1078_v20 = vld [vmem:[#allocation2 + $0x138] sm:$0xff]   ;;  %v853_v41 = vld [vmem:[%s1188_s2] ss:$0 sm:$0xff] }
  0x29   :  { %929 = vmatpush3.bf16.msra.mxu0 %v1032_v22  ;;  %v1079_v21 = vld [vmem:[#allocation2 + $0x1b8] sm:$0xff]  }
  0x2a   :  { %951 = vmatpush3.bf16.msra.mxu1 %v1033_v23  ;;  %930 = vmatprep.subr.bf16.mxu0 %v1034_v27  ;;  %v1080_v22 = vld [vmem:[%s1186_s0 + $0x8] ss:$16 sps:$4 sm:$0xff]   ;;  %v1084_v24 = vld [vmem:[%s1186_s0 + $0xc] ss:$16 sps:$4 sm:$0xff]  }
  0x2b   :  { %952 = vmatprep.subr.bf16.mxu1 %v1035_v28  ;;  %v1082_v23 = vld [vmem:[%s1186_s0 + $0x28] ss:$16 sps:$4 sm:$0xff]   ;;  %v1085_v25 = vld [vmem:[%s1186_s0 + $0x2c] ss:$16 sps:$4 sm:$0xff]   ;;  %v91_v26 = vrot.slane %v1080_v22, %v1146_v37  ;;  %v98_v28 = vrot.slane %v1084_v24, %v1146_v37 }
  0x2c   :  { %v105_v27 = vrot.slane %v1082_v23, %v1146_v37 }
  0x2d   :  { %931 = vmatpush3.bf16.msra.mxu0 %v1036_v29  ;;  %v112_v29 = vrot.slane %v1085_v25, %v1146_v37 }
  0x2e   :  { %953 = vmatpush3.bf16.msra.mxu1 %v1037_v30  ;;  %932 = vmatprep.subr.bf16.mxu0 %v1038_v33  ;;  %v114_v30 = vcombine.high %v91_v26, %v105_v27  ;;  %v113_v31 = vcombine.low %v91_v26, %v105_v27 }
  0x2f   :  { %954 = vmatprep.subr.bf16.mxu1 %v1039_v34  ;;  %v116_v32 = vcombine.high %v98_v28, %v112_v29  ;;  %v115_v33 = vcombine.low %v98_v28, %v112_v29 }
  0x30   :  { %v130_v34 = vpack.c.bf16 %v114_v30, %v114_v30 }
  0x31   :  { %933 = vmatpush3.bf16.msra.mxu0 %v1040_v35  ;;  %v129_v35 = vpack.c.bf16 %v113_v31, %v113_v31  ;;  %v131_v38 = vpack.c.bf16 %v115_v33, %v115_v33 }
  0x32   :  { %955 = vmatpush3.bf16.msra.mxu1 %v1041_v36  ;;  %962 = vmatprep.subr.bf16.mxu0 %v1048_v44  ;;  %v132_v36 = vpack.c.bf16 %v116_v32, %v116_v32 }
  0x33   :  { %984 = vmatprep.subr.bf16.mxu1 %v1049_v47 }
  0x34   :  { %685 = vmatmul.mubr.bf16.vlgmr.msra.gmra.mrb[0].mxu0 %v125_v55 }
  0x35   :  { %725 = vmatmul.mubr.bf16.vlgmr.msra.gmra.mrb[0].mxu1 %v127_v58  ;;  %963 = vmatpush3.bf16.msra.mxu0 %v1050_v50 }
  0x36   :  { %985 = vmatpush3.bf16.msra.mxu1 %v1051_v53  ;;  %964 = vmatprep.subr.bf16.mxu0 %v1052_v56 }
  0x37   :  { %986 = vmatprep.subr.bf16.mxu1 %v1053_v59  ;;  %764 = vmatprep.mubr.bf16.mxu0 %v130_v34 }
  0x38   :  { %804 = vmatprep.mubr.bf16.mxu1 %v132_v36 }
  0x39   :  { %965 = vmatpush3.bf16.msra.mxu0 %v1054_v60 }
  0x3a   :  { %987 = vmatpush3.bf16.msra.mxu1 %v1055_v61  ;;  %966 = vmatprep.subr.bf16.mxu0 %v1056_v62 }
  0x3b   :  { %988 = vmatprep.subr.bf16.mxu1 %v1057_v63 }
  0x3d   :  { %967 = vmatpush3.bf16.msra.mxu0 %v1058_v0 }
  0x3e   :  { %989 = vmatpush3.bf16.msra.mxu1 %v1059_v1  ;;  %968 = vmatprep.subr.bf16.mxu0 %v1060_v2 }
  0x3f   :  { %990 = vmatprep.subr.bf16.mxu1 %v1061_v3 }
  0x41   :  { %969 = vmatpush3.bf16.msra.mxu0 %v1062_v4 }
  0x42   :  { %991 = vmatpush3.bf16.msra.mxu1 %v1063_v5  ;;  %970 = vmatprep.subr.bf16.mxu0 %v1064_v6 }
  0x43   :  { %992 = vmatprep.subr.bf16.mxu1 %v1065_v7 }
  0x45   :  { %971 = vmatpush3.bf16.msra.mxu0 %v1066_v8 }
  0x46   :  { %993 = vmatpush3.bf16.msra.mxu1 %v1067_v9  ;;  %972 = vmatprep.subr.bf16.mxu0 %v1068_v10 }
  0x47   :  { %994 = vmatprep.subr.bf16.mxu1 %v1069_v11 }
  0x49   :  { %973 = vmatpush3.bf16.msra.mxu0 %v1070_v12 }
  0x4a   :  { %995 = vmatpush3.bf16.msra.mxu1 %v1071_v13  ;;  %974 = vmatprep.subr.bf16.mxu0 %v1072_v14 }
  0x4b   :  { %996 = vmatprep.subr.bf16.mxu1 %v1073_v15 }
  0x4d   :  { %975 = vmatpush3.bf16.msra.mxu0 %v1074_v16 }
  0x4e   :  { %997 = vmatpush3.bf16.msra.mxu1 %v1075_v17  ;;  %976 = vmatprep.subr.bf16.mxu0 %v1076_v18 }
  0x4f   :  { %998 = vmatprep.subr.bf16.mxu1 %v1077_v19 }
  0x51   :  { %977 = vmatpush3.bf16.msra.mxu0 %v1078_v20 }
  0x52   :  { %999 = vmatpush3.bf16.msra.mxu1 %v1079_v21 }
  0x54   :  { %765 = vmatmul.mubr.bf16.vlgmr.msra.gmra.mrb[4].mxu0 %v129_v35 }
  0x55   :  { %805 = vmatmul.mubr.bf16.vlgmr.msra.gmra.mrb[4].mxu1 %v131_v38 }
 0x107   :  { %v934_v39 = vpop.f32.mrb[0].mxu0 }
 0x108   :  { %v956_v40 = vpop.f32.mrb[0].mxu1  ;;  %v935_v37 = vpop.f32.mrb[1].mxu0 }
 0x109   :  { %v936_v42 = vadd.f32 %v935_v37, %v934_v39  ;;  %v957_v43 = vpop.f32.mrb[1].mxu1  ;;  %v937_v44 = vpop.f32.mrb[2].mxu0 }
 0x10a   :  { %v958_v45 = vadd.f32 %v957_v43, %v956_v40  ;;  %v959_v46 = vpop.f32.mrb[2].mxu1  ;;  %v938_v47 = vpop.f32.mrb[3].mxu0 }
 0x10b   :  { %v687_v48 = vadd.f32 %v936_v42, %v853_v41  ;;  %v960_v49 = vpop.f32.mrb[3].mxu1 }
 0x10d   :  { %v727_v50 = vadd.f32 %v958_v45, %v687_v48 }
 0x127   :  { %v978_v51 = vpop.f32.mrb[4].mxu0 }
 0x128   :  { %v1000_v52 = vpop.f32.mrb[4].mxu1  ;;  %v979_v53 = vpop.f32.mrb[5].mxu0 }
 0x129   :  { %v980_v54 = vadd.f32 %v979_v53, %v978_v51  ;;  %v1001_v55 = vpop.f32.mrb[5].mxu1  ;;  %v981_v56 = vpop.f32.mrb[6].mxu0 }
 0x12a   :  { %v1002_v57 = vadd.f32 %v1001_v55, %v1000_v52  ;;  %v1003_v58 = vpop.f32.mrb[6].mxu1  ;;  %v982_v59 = vpop.f32.mrb[7].mxu0 }
 0x12b   :  { %v767_v60 = vadd.f32 %v980_v54, %v727_v50  ;;  %v1004_v61 = vpop.f32.mrb[7].mxu1 }
 0x12d   :  { %v807_v62 = vadd.f32 %v1002_v57, %v767_v60 }
 0x12f   :  { %812 = vst [vmem:[#allocation4] sm:$0xff] %v807_v62 }
 0x136   :  { %v830_v63 = vld [vmem:[#allocation4] sm:$0x3] }
 0x137   :  { %831 = vst [vmem:[%s1189_s3] sm:$0x3] %v830_v63 }
 0x138   :  { %848 = vsyncpa [#allocation3], 1 }

</bundles_post_ra>
